<compile_context>
chip_gen: v7x
topology: tpu7x:2x2x1
jax: 0.10.0
libtpu: 0.0.40
codegen_flags: <defaults>
</compile_context>

<pallas_src>
import jax
import jax.numpy as jnp
from jax.experimental import pallas as pl
from jax.experimental.pallas import tpu as pltpu

# Logical dims (PyTorch module).
IN_FEATURES = 784
H1, H2, H3, OUT = 512, 128, 16, 10

# Lane-dense padded widths for the narrow layers.
H3_PAD = 128
OUT_PAD = 128

DEFAULT_TB = 1024   # batch tile for large batches
_SUBLANE = 16       # batch tiles rounded to 16 rows (covers f32(8) and bf16(16) packing)


def _round_up(v, m):
    return ((v + m - 1) // m) * m


def _choose_tiling(n, default_tb=DEFAULT_TB):
    """Pick (batch_tile, padded_batch).

    Large batches use the full DEFAULT_TB tile. Smaller batches use
    ~ceil(n/2) rows per tile so the grid has >= 2 steps (both TensorCores get
    work on v7x) without padding a tiny batch up to 1024 rows.
    """
    if n >= 2 * default_tb:
        tb = default_tb
    else:
        tb = _round_up(max(pl.cdiv(n, 2), _SUBLANE), _SUBLANE)
    n_pad = _round_up(n, tb)
    return tb, n_pad


def _mlp_kernel(x_ref,
                w1_ref, b1_ref,
                w2_ref, b2_ref,
                w3_ref, b3_ref,
                w4_ref, b4_ref,
                o_ref):
    # Cast the f32 input tile to bf16 in VMEM (saves the wrapper-side HBM
    # pad/convert pass; the MXU pads K internally anyway).
    x = x_ref[...].astype(jnp.bfloat16)                              # (tb, 784)

    # Layer 1: (tb,784)bf16 @ (784,512)bf16 -> f32 acc, +bias, ReLU
    h = jnp.dot(x, w1_ref[...], preferred_element_type=jnp.float32)
    h = jnp.maximum(h + b1_ref[...], 0.0).astype(jnp.bfloat16)
    # Layer 2: (tb,512) @ (512,128)
    h = jnp.dot(h, w2_ref[...], preferred_element_type=jnp.float32)
    h = jnp.maximum(h + b2_ref[...], 0.0).astype(jnp.bfloat16)
    # Layer 3: (tb,128) @ (128,128)  (cols 16..127 zero-padded)
    h = jnp.dot(h, w3_ref[...], preferred_element_type=jnp.float32)
    h = jnp.maximum(h + b3_ref[...], 0.0).astype(jnp.bfloat16)
    # Layer 4 (logits): (tb,128) @ (128,128)  (only [:16, :10] nonzero)
    h = jnp.dot(h, w4_ref[...], preferred_element_type=jnp.float32)
    o_ref[...] = (h + b4_ref[...]).astype(o_ref.dtype)               # bf16 store


def fcnn_forward(x_nchw, params, *, default_tb=DEFAULT_TB):
    """Forward pass of ImageClassifier_fcnn.

    x_nchw: (N, 1, 28, 28) float32 (NCHW, like PyTorch)
    params: dict with w1..w4 stored as (in, out) and b1..b4 as (1, out), f32.
    returns: (N, 10) float32 logits
    """
    n = x_nchw.shape[0]
    x = x_nchw.reshape(n, -1).astype(jnp.float32)          # nn.Flatten (row-major)
    assert x.shape[1] == IN_FEATURES

    tb, n_pad = _choose_tiling(n, default_tb)
    if n_pad != n:
        x = jnp.pad(x, ((0, n_pad - n), (0, 0)))           # batch pad only

    # Weights: bf16, zero-padded on the narrow layers so padded rows/cols
    # contribute exactly 0. Biases stay f32.
    w1 = params["w1"].astype(jnp.bfloat16)                                       # (784,512)
    b1 = params["b1"].astype(jnp.float32)                                        # (1,512)
    w2 = params["w2"].astype(jnp.bfloat16)                                       # (512,128)
    b2 = params["b2"].astype(jnp.float32)                                        # (1,128)
    w3 = jnp.pad(params["w3"], ((0, 0), (0, H3_PAD - H3))).astype(jnp.bfloat16)  # (128,128)
    b3 = jnp.pad(params["b3"], ((0, 0), (0, H3_PAD - H3))).astype(jnp.float32)   # (1,128)
    w4 = jnp.pad(params["w4"], ((0, H3_PAD - H3), (0, OUT_PAD - OUT))).astype(jnp.bfloat16)
    b4 = jnp.pad(params["b4"], ((0, 0), (0, OUT_PAD - OUT))).astype(jnp.float32)

    const = lambda i: (0, 0)   # weights/biases: same block every grid step
    grid = (n_pad // tb,)

    out_padded = pl.pallas_call(
        _mlp_kernel,
        out_shape=jax.ShapeDtypeStruct((n_pad, OUT_PAD), jnp.bfloat16),
        grid_spec=pltpu.PrefetchScalarGridSpec(
            num_scalar_prefetch=0,
            grid=grid,
            in_specs=[
                pl.BlockSpec((tb, IN_FEATURES), lambda i: (i, 0)),  # x tile (f32, 784 = full dim)
                pl.BlockSpec((IN_FEATURES, H1), const),             # w1
                pl.BlockSpec((1, H1), const),                       # b1
                pl.BlockSpec((H1, H2), const),                      # w2
                pl.BlockSpec((1, H2), const),                       # b2
                pl.BlockSpec((H2, H3_PAD), const),                  # w3
                pl.BlockSpec((1, H3_PAD), const),                   # b3
                pl.BlockSpec((H3_PAD, OUT_PAD), const),             # w4
                pl.BlockSpec((1, OUT_PAD), const),                  # b4
            ],
            out_specs=pl.BlockSpec((tb, OUT_PAD), lambda i: (i, 0)),
        ),
        compiler_params=pltpu.CompilerParams(
            dimension_semantics=("parallel",),       # batch axis -> megacore on v7x
            vmem_limit_bytes=32 * 1024 * 1024,       # headroom for TB=1024 f32 input on v5e
        ),
    )(x, w1, b1, w2, b2, w3, b3, w4, b4)

    # Slice away batch padding + lane padding of the logit dim; upcast to f32.
    return out_padded[:n, :OUT].astype(jnp.float32)


def init_params(key):
    """Deterministic parameter init matching PyTorch Linear default
    (U(-1/sqrt(fan_in), 1/sqrt(fan_in)))."""
    dims = [(IN_FEATURES, H1), (H1, H2), (H2, H3), (H3, OUT)]
    params = {}
    for i, (fan_in, fan_out) in enumerate(dims, start=1):
        key, kw, kb = jax.random.split(key, 3)
        bound = 1.0 / (fan_in ** 0.5)
        # stored as (in, out) == PyTorch weight.T
        params[f"w{i}"] = jax.random.uniform(
            kw, (fan_in, fan_out), jnp.float32, minval=-bound, maxval=bound)
        params[f"b{i}"] = jax.random.uniform(
            kb, (1, fan_out), jnp.float32, minval=-bound, maxval=bound)
    return params


def _reference_forward(x_nchw, params):
    """Pure-JAX reference matching the kernel's bf16-weight / f32-accumulate
    numerics (PyTorch semantics up to bf16 rounding)."""
    h = x_nchw.reshape(x_nchw.shape[0], -1).astype(jnp.bfloat16)
    for i in range(1, 5):
        w = params[f"w{i}"].astype(jnp.bfloat16)
        h = jnp.dot(h, w, preferred_element_type=jnp.float32) + params[f"b{i}"]
        if i < 4:
            h = jnp.maximum(h, 0.0).astype(jnp.bfloat16)
    return h.astype(jnp.float32)


if __name__ == "__main__":
    key = jax.random.PRNGKey(0)
    key, kx = jax.random.split(key)

    # Small deterministic MNIST-like batch: (N=2, C=1, H=28, W=28), NCHW.
    x = jax.random.normal(kx, (2, 1, 28, 28), dtype=jnp.float32)
    params = init_params(key)

    logits = fcnn_forward(x, params)
    logits = jax.block_until_ready(logits)

    ref = _reference_forward(x, params)
    assert logits.shape == (2, 10)
    assert jnp.allclose(logits, ref, atol=2e-2, rtol=2e-2), (
        "max abs err", float(jnp.max(jnp.abs(logits - ref))))

    print("KERNEL_OK")
</pallas_src>

<mosaic_0001>
module attributes {stable_mosaic.version = 11 : i64} {
  func.func @_mlp_kernel(%arg0: i32, %arg1: memref<16x784xf32, #tpu.memory_space<vmem>>, %arg2: memref<784x512xbf16, #tpu.memory_space<vmem>>, %arg3: memref<1x512xf32, #tpu.memory_space<vmem>>, %arg4: memref<512x128xbf16, #tpu.memory_space<vmem>>, %arg5: memref<1x128xf32, #tpu.memory_space<vmem>>, %arg6: memref<128x128xbf16, #tpu.memory_space<vmem>>, %arg7: memref<1x128xf32, #tpu.memory_space<vmem>>, %arg8: memref<128x128xbf16, #tpu.memory_space<vmem>>, %arg9: memref<1x128xf32, #tpu.memory_space<vmem>>, %arg10: memref<16x128xbf16, #tpu.memory_space<vmem>>) attributes {dimension_semantics = [#tpu.dimension_semantics<parallel>], iteration_bounds = array<i64: 1>, scalar_prefetch = 0 : i64, scratch_operands = 0 : i64, tpu.core_type = #tpu.core_type<tc>, window_params = [{transform_indices = @transform_0, window_bounds = array<i64: 16, 784>}, {pipeline_mode = #tpu.pipeline_mode<synchronous>, transform_indices = @transform_1, window_bounds = array<i64: 784, 512>}, {pipeline_mode = #tpu.pipeline_mode<synchronous>, transform_indices = @transform_2, window_bounds = array<i64: 1, 512>}, {pipeline_mode = #tpu.pipeline_mode<synchronous>, transform_indices = @transform_3, window_bounds = array<i64: 512, 128>}, {pipeline_mode = #tpu.pipeline_mode<synchronous>, transform_indices = @transform_4, window_bounds = array<i64: 1, 128>}, {pipeline_mode = #tpu.pipeline_mode<synchronous>, transform_indices = @transform_5, window_bounds = array<i64: 128, 128>}, {pipeline_mode = #tpu.pipeline_mode<synchronous>, transform_indices = @transform_6, window_bounds = array<i64: 1, 128>}, {pipeline_mode = #tpu.pipeline_mode<synchronous>, transform_indices = @transform_7, window_bounds = array<i64: 128, 128>}, {pipeline_mode = #tpu.pipeline_mode<synchronous>, transform_indices = @transform_8, window_bounds = array<i64: 1, 128>}, {transform_indices = @transform_9, window_bounds = array<i64: 16, 128>}]} {
    %c0 = arith.constant 0 : index
    %c0_0 = arith.constant 0 : index
    %0 = vector.load %arg1[%c0, %c0_0] : memref<16x784xf32, #tpu.memory_space<vmem>>, vector<16x784xf32>
    %1 = arith.truncf %0 : vector<16x784xf32> to vector<16x784xbf16>
    %c0_1 = arith.constant 0 : index
    %c0_2 = arith.constant 0 : index
    %2 = vector.load %arg2[%c0_1, %c0_2] : memref<784x512xbf16, #tpu.memory_space<vmem>>, vector<784x512xbf16>
    %cst = arith.constant dense<0.000000e+00> : vector<16x512xf32>
    %3 = tpu.matmul %1, %2, %cst {dimension_numbers = #tpu.dot_dimension_numbers<[1], [0], [0], [1], [0, 0, 1, 1], [], []>} : vector<16x784xbf16>, vector<784x512xbf16>, vector<16x512xf32> -> vector<16x512xf32>
    %c0_3 = arith.constant 0 : index
    %c0_4 = arith.constant 0 : index
    %4 = vector.load %arg3[%c0_3, %c0_4] : memref<1x512xf32, #tpu.memory_space<vmem>>, vector<1x512xf32>
    %5 = vector.broadcast %4 : vector<1x512xf32> to vector<16x512xf32>
    %6 = arith.addf %3, %5 : vector<16x512xf32>
    %cst_5 = arith.constant 0.000000e+00 : f32
    %7 = vector.broadcast %cst_5 : f32 to vector<16x512xf32>
    %8 = arith.maximumf %6, %7 : vector<16x512xf32>
    %9 = arith.truncf %8 : vector<16x512xf32> to vector<16x512xbf16>
    %c0_6 = arith.constant 0 : index
    %c0_7 = arith.constant 0 : index
    %10 = vector.load %arg4[%c0_6, %c0_7] : memref<512x128xbf16, #tpu.memory_space<vmem>>, vector<512x128xbf16>
    %cst_8 = arith.constant dense<0.000000e+00> : vector<16x128xf32>
    %11 = tpu.matmul %9, %10, %cst_8 {dimension_numbers = #tpu.dot_dimension_numbers<[1], [0], [0], [1], [0, 0, 1, 1], [], []>} : vector<16x512xbf16>, vector<512x128xbf16>, vector<16x128xf32> -> vector<16x128xf32>
    %c0_9 = arith.constant 0 : index
    %c0_10 = arith.constant 0 : index
    %12 = vector.load %arg5[%c0_9, %c0_10] : memref<1x128xf32, #tpu.memory_space<vmem>>, vector<1x128xf32>
    %13 = vector.broadcast %12 : vector<1x128xf32> to vector<16x128xf32>
    %14 = arith.addf %11, %13 : vector<16x128xf32>
    %cst_11 = arith.constant 0.000000e+00 : f32
    %15 = vector.broadcast %cst_11 : f32 to vector<16x128xf32>
    %16 = arith.maximumf %14, %15 : vector<16x128xf32>
    %17 = arith.truncf %16 : vector<16x128xf32> to vector<16x128xbf16>
    %c0_12 = arith.constant 0 : index
    %c0_13 = arith.constant 0 : index
    %18 = vector.load %arg6[%c0_12, %c0_13] : memref<128x128xbf16, #tpu.memory_space<vmem>>, vector<128x128xbf16>
    %cst_14 = arith.constant dense<0.000000e+00> : vector<16x128xf32>
    %19 = tpu.matmul %17, %18, %cst_14 {dimension_numbers = #tpu.dot_dimension_numbers<[1], [0], [0], [1], [0, 0, 1, 1], [], []>} : vector<16x128xbf16>, vector<128x128xbf16>, vector<16x128xf32> -> vector<16x128xf32>
    %c0_15 = arith.constant 0 : index
    %c0_16 = arith.constant 0 : index
    %20 = vector.load %arg7[%c0_15, %c0_16] : memref<1x128xf32, #tpu.memory_space<vmem>>, vector<1x128xf32>
    %21 = vector.broadcast %20 : vector<1x128xf32> to vector<16x128xf32>
    %22 = arith.addf %19, %21 : vector<16x128xf32>
    %cst_17 = arith.constant 0.000000e+00 : f32
    %23 = vector.broadcast %cst_17 : f32 to vector<16x128xf32>
    %24 = arith.maximumf %22, %23 : vector<16x128xf32>
    %25 = arith.truncf %24 : vector<16x128xf32> to vector<16x128xbf16>
    %c0_18 = arith.constant 0 : index
    %c0_19 = arith.constant 0 : index
    %26 = vector.load %arg8[%c0_18, %c0_19] : memref<128x128xbf16, #tpu.memory_space<vmem>>, vector<128x128xbf16>
    %cst_20 = arith.constant dense<0.000000e+00> : vector<16x128xf32>
    %27 = tpu.matmul %25, %26, %cst_20 {dimension_numbers = #tpu.dot_dimension_numbers<[1], [0], [0], [1], [0, 0, 1, 1], [], []>} : vector<16x128xbf16>, vector<128x128xbf16>, vector<16x128xf32> -> vector<16x128xf32>
    %c0_21 = arith.constant 0 : index
    %c0_22 = arith.constant 0 : index
    %28 = vector.load %arg9[%c0_21, %c0_22] : memref<1x128xf32, #tpu.memory_space<vmem>>, vector<1x128xf32>
    %29 = vector.broadcast %28 : vector<1x128xf32> to vector<16x128xf32>
    %30 = arith.addf %27, %29 : vector<16x128xf32>
    %31 = arith.truncf %30 : vector<16x128xf32> to vector<16x128xbf16>
    %c0_23 = arith.constant 0 : index
    %c0_24 = arith.constant 0 : index
    %32 = vector.load %arg10[%c0_23, %c0_24] : memref<16x128xbf16, #tpu.memory_space<vmem>>, vector<16x128xbf16>
    tpu.vector_store %arg10[%c0_23, %c0_24], %31 {strides = array<i32>} : memref<16x128xbf16, #tpu.memory_space<vmem>>, vector<16x128xbf16>,
    return
  }
  func.func @transform_0(%arg0: i32) -> (i32, i32) {
    %c0_i32 = arith.constant 0 : i32
    %c0_i32_0 = arith.constant 0 : i32
    return %arg0, %c0_i32 : i32, i32
  }
  func.func @transform_1(%arg0: i32) -> (i32, i32) {
    %c0_i32 = arith.constant 0 : i32
    %c0_i32_0 = arith.constant 0 : i32
    %c0_i32_1 = arith.constant 0 : i32
    return %c0_i32, %c0_i32_0 : i32, i32
  }
  func.func @transform_2(%arg0: i32) -> (i32, i32) {
    %c0_i32 = arith.constant 0 : i32
    %c0_i32_0 = arith.constant 0 : i32
    %c0_i32_1 = arith.constant 0 : i32
    return %c0_i32, %c0_i32_0 : i32, i32
  }
  func.func @transform_3(%arg0: i32) -> (i32, i32) {
    %c0_i32 = arith.constant 0 : i32
    %c0_i32_0 = arith.constant 0 : i32
    %c0_i32_1 = arith.constant 0 : i32
    return %c0_i32, %c0_i32_0 : i32, i32
  }
  func.func @transform_4(%arg0: i32) -> (i32, i32) {
    %c0_i32 = arith.constant 0 : i32
    %c0_i32_0 = arith.constant 0 : i32
    %c0_i32_1 = arith.constant 0 : i32
    return %c0_i32, %c0_i32_0 : i32, i32
  }
  func.func @transform_5(%arg0: i32) -> (i32, i32) {
    %c0_i32 = arith.constant 0 : i32
    %c0_i32_0 = arith.constant 0 : i32
    %c0_i32_1 = arith.constant 0 : i32
    return %c0_i32, %c0_i32_0 : i32, i32
  }
  func.func @transform_6(%arg0: i32) -> (i32, i32) {
    %c0_i32 = arith.constant 0 : i32
    %c0_i32_0 = arith.constant 0 : i32
    %c0_i32_1 = arith.constant 0 : i32
    return %c0_i32, %c0_i32_0 : i32, i32
  }
  func.func @transform_7(%arg0: i32) -> (i32, i32) {
    %c0_i32 = arith.constant 0 : i32
    %c0_i32_0 = arith.constant 0 : i32
    %c0_i32_1 = arith.constant 0 : i32
    return %c0_i32, %c0_i32_0 : i32, i32
  }
  func.func @transform_8(%arg0: i32) -> (i32, i32) {
    %c0_i32 = arith.constant 0 : i32
    %c0_i32_0 = arith.constant 0 : i32
    %c0_i32_1 = arith.constant 0 : i32
    return %c0_i32, %c0_i32_0 : i32, i32
  }
  func.func @transform_9(%arg0: i32) -> (i32, i32) {
    %c0_i32 = arith.constant 0 : i32
    %c0_i32_0 = arith.constant 0 : i32
    return %arg0, %c0_i32 : i32, i32
  }
}

</mosaic_0001>

<bundles_post_ra>
// kernel: tpu_custom_call.1
= control target key start
LH: loop header
LB: loop body
LE: loop exit
PB: predicated region body
PF: predicated region fallthrough
CT: control target
= control target key end

     0   :  { %14 = vsyncpa [#allocation3], 0  ;;  %s3353_s0 = inlined_call_operand.hbm [shape: f32[16,784], index: 0, kind: input, shape index: {}]   ;;  %s3354_s1 = inlined_call_operand.hbm [shape: bf16[784,512], index: 1, kind: input, shape index: {}]   ;;  %s3355_s2 = inlined_call_operand.vmem [shape: f32[1,512], index: 2, kind: input, shape index: {}]   ;;  %s3356_s3 = inlined_call_operand.hbm [shape: bf16[512,128], index: 3, kind: input, shape index: {}]   ;;  %s3357_s4 = inlined_call_operand.vmem [shape: f32[1,128], index: 4, kind: input, shape index: {}]   ;;  %s3358_s5 = inlined_call_operand.hbm [shape: bf16[128,128], index: 5, kind: input, shape index: {}]   ;;  %s3359_s6 = inlined_call_operand.vmem [shape: f32[1,128], index: 6, kind: input, shape index: {}]   ;;  %s3360_s7 = inlined_call_operand.hbm [shape: bf16[128,128], index: 7, kind: input, shape index: {}]   ;;  %s3361_s8 = inlined_call_operand.vmem [shape: f32[1,128], index: 8, kind: input, shape index: {}]   ;;  %s3362_s9 = inlined_call_operand.hbm [shape: bf16[16,128], index: 9, kind: output, shape index: {}]  }
   0x1   :  { %15 = vsyncpa [#allocation6], 0 }
   0x2   :  { %16 = vsyncpa [#allocation9], 0 }
   0x3   :  { %17 = vsyncpa [#allocation4], 0  ;;  %s3174_s30 = smov [#allocation5]   ;;  %s3034_s13 = scalar_lea.hbm %s3354_s1, 25088 }
   0x4   :  { %s35_s10 = sshll.u32 %s3174_s30, 4  ;;  %p3035_p0 = scmp.ne.s32.totalorder %s3354_s1, %s3034_s13  ;;  %s36_s10 = int_to_ptr.vmem [resolvable:$true] %s35_s10 }
   0x5   :  { %p3038_p1 = scmp.lt.u32.totalorder %s3034_s13, %s3354_s1 }
   0x7   :  { %p3040_p2 = pnand %p3038_p1, %p3035_p0 }
   0x9   :  { %3043 = shalt.err (!%p3040_p2)
}
   0xa   :  { %s3044_s18 = scalar_lea.vmem %s36_s10, 25088  ;;  %p3049_p4 = scmp.lt.s32.totalorder %s36_s10, %s36_s10 }
   0xb   :  { %p3045_p3 = scmp.ne.s32.totalorder %s36_s10, %s3044_s18  ;;  %p3050_p5 = scmp.lt.s32.totalorder %s3044_s18, %s3044_s18 }
   0xd   :  { %p3051_p6 = por %p3050_p5, %p3049_p4 }
   0xf   :  { %p3052_p7 = pnand %p3051_p6, %p3045_p3 }
  0x11   :  { %3055 = shalt.err (!%p3052_p7)
}
  0x12   :  { %s3175_s19 = smov 256   ;;  %s3176_s20 = smov 16  }
  0x13   :  { %41 = dma.hbm_to_vmem [thread:$0]  %s3354_s1, 25088, %s36_s10, [#allocation6], %s3175_s19, %s3175_s19, %s3176_s20  }
  0x14   :  { %s3177_s23 = smov [#allocation8]   ;;  %s3178_s25 = smov [#allocation2]  }
  0x15   :  { %s63_s24 = sshll.u32 %s3177_s23, 4  ;;  %s23_s26 = sshll.u32 %s3178_s25, 4  ;;  %s64_s24 = int_to_ptr.vmem [resolvable:$true] %s63_s24  ;;  %s24_s26 = int_to_ptr.vmem [resolvable:$true] %s23_s26 }
  0x16   :  { %s3056_s29 = scalar_lea.hbm %s3358_s5, 1024 }
  0x17   :  { %p3057_p8 = scmp.ne.s32.totalorder %s3358_s5, %s3056_s29  ;;  %p3060_p9 = scmp.lt.u32.totalorder %s3056_s29, %s3358_s5 }
  0x19   :  { %p3062_p10 = pnand %p3060_p9, %p3057_p8 }
  0x1b   :  { %3065 = shalt.err (!%p3062_p10)
}
  0x1c   :  { %s3066_s1 = scalar_lea.vmem %s64_s24, 1024  ;;  %p3071_p12 = scmp.lt.s32.totalorder %s64_s24, %s64_s24 }
  0x1d   :  { %p3067_p11 = scmp.ne.s32.totalorder %s64_s24, %s3066_s1  ;;  %p3072_p13 = scmp.lt.s32.totalorder %s3066_s1, %s3066_s1 }
  0x1f   :  { %p3073_p0 = por %p3072_p13, %p3071_p12 }
  0x21   :  { %p3074_p1 = pnand %p3073_p0, %p3067_p11 }
  0x23   :  { %3077 = shalt.err (!%p3074_p1)
}
  0x24   :  { %s3179_s10 = smov 64   ;;  %s3180_s14 = smov 4  }
  0x25   :  { %69 = dma.hbm_to_vmem [thread:$0]  %s3358_s5, 1024, %s64_s24, [#allocation9], %s3179_s10, %s3179_s10, %s3180_s14  }
  0x26   :  { %s3078_s19 = scalar_lea.hbm %s3353_s0, 1792 }
  0x27   :  { %p3079_p2 = scmp.ne.s32.totalorder %s3353_s0, %s3078_s19  ;;  %p3082_p3 = scmp.lt.u32.totalorder %s3078_s19, %s3353_s0 }
  0x29   :  { %p3084_p4 = pnand %p3082_p3, %p3079_p2 }
  0x2b   :  { %3087 = shalt.err (!%p3084_p4)
}
  0x2c   :  { %s3088_s25 = scalar_lea.vmem %s24_s26, 1792  ;;  %p3093_p6 = scmp.lt.s32.totalorder %s24_s26, %s24_s26 }
  0x2d   :  { %p3089_p5 = scmp.ne.s32.totalorder %s24_s26, %s3088_s25  ;;  %p3094_p7 = scmp.lt.s32.totalorder %s3088_s25, %s3088_s25 }
  0x2f   :  { %p3095_p8 = por %p3094_p7, %p3093_p6 }
  0x31   :  { %p3096_p9 = pnand %p3095_p8, %p3089_p5 }
  0x33   :  { %3099 = shalt.err (!%p3096_p9)
}
  0x34   :  { %s3181_s5 = smov 896   ;;  %s3182_s24 = smov 56  }
  0x35   :  { %29 = dma.hbm_to_vmem [thread:$0]  %s3353_s0, 1792, %s24_s26, [#allocation3], %s3181_s5, %s3181_s5, %s3182_s24  }
  0x36   :  { %s3183_s29 = smov [#allocation7]   ;;  %s3184_s11 = smov [#allocation10]  }
  0x37   :  { %s49_s30 = sshll.u32 %s3183_s29, 4  ;;  %s77_s12 = sshll.u32 %s3184_s11, 4  ;;  %s50_s30 = int_to_ptr.vmem [resolvable:$true] %s49_s30  ;;  %s78_s12 = int_to_ptr.vmem [resolvable:$true] %s77_s12 }
  0x38   :  { %s3100_s15 = scalar_lea.hbm %s3356_s3, 4096 }
  0x39   :  { %p3101_p10 = scmp.ne.s32.totalorder %s3356_s3, %s3100_s15  ;;  %p3104_p11 = scmp.lt.u32.totalorder %s3100_s15, %s3356_s3 }
  0x3b   :  { %p3106_p12 = pnand %p3104_p11, %p3101_p10 }
  0x3d   :  { %3109 = shalt.err (!%p3106_p12)
}
  0x3e   :  { %s3110_s0 = scalar_lea.vmem %s50_s30, 4096  ;;  %p3115_p0 = scmp.lt.s32.totalorder %s50_s30, %s50_s30 }
  0x3f   :  { %p3111_p13 = scmp.ne.s32.totalorder %s50_s30, %s3110_s0  ;;  %p3116_p1 = scmp.lt.s32.totalorder %s3110_s0, %s3110_s0 }
  0x41   :  { %p3117_p2 = por %p3116_p1, %p3115_p0 }
  0x43   :  { %p3118_p3 = pnand %p3117_p2, %p3111_p13 }
  0x45   :  { %3121 = shalt.err (!%p3118_p3)
}
  0x46   :  { %55 = dma.hbm_to_vmem [thread:$0]  %s3356_s3, 4096, %s50_s30, [#allocation6], %s3179_s10, %s3179_s10, %s3180_s14  }
  0x47   :  { %s3122_s23 = scalar_lea.hbm %s3360_s7, 1024 }
  0x48   :  { %p3123_p4 = scmp.ne.s32.totalorder %s3360_s7, %s3122_s23  ;;  %p3126_p5 = scmp.lt.u32.totalorder %s3122_s23, %s3360_s7 }
  0x4a   :  { %p3128_p6 = pnand %p3126_p5, %p3123_p4 }
  0x4c   :  { %3131 = shalt.err (!%p3128_p6)
}
  0x4d   :  { %s3132_s28 = scalar_lea.vmem %s78_s12, 1024  ;;  %p3137_p8 = scmp.lt.s32.totalorder %s78_s12, %s78_s12 }
  0x4e   :  { %p3133_p7 = scmp.ne.s32.totalorder %s78_s12, %s3132_s28  ;;  %p3138_p9 = scmp.lt.s32.totalorder %s3132_s28, %s3132_s28 }
  0x50   :  { %p3139_p10 = por %p3138_p9, %p3137_p8 }
  0x52   :  { %p3140_p11 = pnand %p3139_p10, %p3133_p7 }
  0x54   :  { %3143 = shalt.err (!%p3140_p11)
}
  0x55   :  { %83 = dma.hbm_to_vmem [thread:$0]  %s3360_s7, 1024, %s78_s12, [#allocation9], %s3179_s10, %s3179_s10, %s3180_s14  }
  0x56   :  { %3166 = dma.done.wait [#allocation3], 1792  }
  0x57   :  { %3167 = vsyncadd [#allocation3], 4294965504 }
  0x58   :  { %3168 = dma.done.wait [#allocation6], 29184  }
  0x59   :  { %3169 = vsyncadd [#allocation6], 4294938112 }
  0x5a   :  { %3170 = dma.done.wait [#allocation9], 2048  }
  0x5b   :  { %3171 = vsyncadd [#allocation9], 4294965248  ;;  %v2692_v0 = vld [vmem:[#allocation5 + $0x4] ss:$16 sps:$4 sm:$0xff]   ;;  %v2694_v1 = vld [vmem:[#allocation5 + $0xc] ss:$16 sps:$4 sm:$0xff]  }
  0x5c   :  { %1325 = vmatprep.subr.bf16.mxu0 %v2692_v0  ;;  %v2696_v2 = vld [vmem:[#allocation5] ss:$16 sps:$4 sm:$0xff]   ;;  %v2697_v3 = vld [vmem:[#allocation5 + $0x8] ss:$16 sps:$4 sm:$0xff]   ;;  %1497 = vmatprep.subr.bf16.mxu1 %v2694_v1  ;;  %v2698_v4 = vld [vmem:[#allocation5 + $0x24] ss:$16 sps:$4 sm:$0xff]  }
  0x5d   :  { %1326 = vmatpush1.bf16.msra.mxu0 %v2696_v2  ;;  %1498 = vmatpush1.bf16.msra.mxu1 %v2697_v3  ;;  %v2700_v5 = vld [vmem:[#allocation5 + $0x2c] ss:$16 sps:$4 sm:$0xff]   ;;  %v2702_v6 = vld [vmem:[#allocation5 + $0x20] ss:$16 sps:$4 sm:$0xff]   ;;  %v2703_v7 = vld [vmem:[#allocation5 + $0x28] ss:$16 sps:$4 sm:$0xff]  }
  0x5e   :  { %1327 = vmatprep.subr.bf16.mxu0 %v2698_v4  ;;  %1499 = vmatprep.subr.bf16.mxu1 %v2700_v5  ;;  %v2704_v8 = vld [vmem:[#allocation5 + $0x44] ss:$16 sps:$4 sm:$0xff]   ;;  %v2706_v9 = vld [vmem:[#allocation5 + $0x4c] ss:$16 sps:$4 sm:$0xff]   ;;  %v2708_v10 = vld [vmem:[#allocation5 + $0x40] ss:$16 sps:$4 sm:$0xff]  }
  0x5f   :  { %v2709_v11 = vld [vmem:[#allocation5 + $0x48] ss:$16 sps:$4 sm:$0xff]   ;;  %v2710_v12 = vld [vmem:[#allocation5 + $0x64] ss:$16 sps:$4 sm:$0xff]   ;;  %v2712_v13 = vld [vmem:[#allocation5 + $0x6c] ss:$16 sps:$4 sm:$0xff]  }
  0x60   :  { %v2714_v14 = vld [vmem:[#allocation5 + $0x60] ss:$16 sps:$4 sm:$0xff]   ;;  %v2715_v15 = vld [vmem:[#allocation5 + $0x68] ss:$16 sps:$4 sm:$0xff]   ;;  %v2716_v16 = vld [vmem:[#allocation5 + $0x84] ss:$16 sps:$4 sm:$0xff]  }
  0x61   :  { %1328 = vmatpush1.bf16.msra.mxu0 %v2702_v6  ;;  %1500 = vmatpush1.bf16.msra.mxu1 %v2703_v7  ;;  %v2718_v17 = vld [vmem:[#allocation5 + $0x8c] ss:$16 sps:$4 sm:$0xff]   ;;  %v2720_v18 = vld [vmem:[#allocation5 + $0x80] ss:$16 sps:$4 sm:$0xff]   ;;  %v2721_v19 = vld [vmem:[#allocation5 + $0x88] ss:$16 sps:$4 sm:$0xff]  }
  0x62   :  { %1329 = vmatprep.subr.bf16.mxu0 %v2704_v8  ;;  %1501 = vmatprep.subr.bf16.mxu1 %v2706_v9  ;;  %v2722_v20 = vld [vmem:[#allocation5 + $0xa4] ss:$16 sps:$4 sm:$0xff]   ;;  %v2724_v21 = vld [vmem:[#allocation5 + $0xac] ss:$16 sps:$4 sm:$0xff]   ;;  %v2726_v22 = vld [vmem:[#allocation5 + $0xa0] ss:$16 sps:$4 sm:$0xff]  }
  0x63   :  { %v2727_v23 = vld [vmem:[#allocation5 + $0xa8] ss:$16 sps:$4 sm:$0xff]   ;;  %v2728_v24 = vld [vmem:[#allocation5 + $0xc4] ss:$16 sps:$4 sm:$0xff]   ;;  %v2730_v25 = vld [vmem:[#allocation5 + $0xcc] ss:$16 sps:$4 sm:$0xff]  }
  0x64   :  { %v2732_v26 = vld [vmem:[#allocation5 + $0xc0] ss:$16 sps:$4 sm:$0xff]   ;;  %v2733_v27 = vld [vmem:[#allocation5 + $0xc8] ss:$16 sps:$4 sm:$0xff]   ;;  %v2734_v28 = vld [vmem:[#allocation5 + $0xe4] ss:$16 sps:$4 sm:$0xff]  }
  0x65   :  { %1330 = vmatpush1.bf16.msra.mxu0 %v2708_v10  ;;  %1502 = vmatpush1.bf16.msra.mxu1 %v2709_v11  ;;  %v2736_v29 = vld [vmem:[#allocation5 + $0xec] ss:$16 sps:$4 sm:$0xff]   ;;  %v2738_v30 = vld [vmem:[#allocation5 + $0xe0] ss:$16 sps:$4 sm:$0xff]   ;;  %v2739_v31 = vld [vmem:[#allocation5 + $0xe8] ss:$16 sps:$4 sm:$0xff]  }
  0x66   :  { %1331 = vmatprep.subr.bf16.mxu0 %v2710_v12  ;;  %1503 = vmatprep.subr.bf16.mxu1 %v2712_v13  ;;  %v2740_v32 = vld [vmem:[#allocation5 + $0x104] ss:$16 sps:$4 sm:$0xff]   ;;  %v2742_v33 = vld [vmem:[#allocation5 + $0x10c] ss:$16 sps:$4 sm:$0xff]   ;;  %v2744_v34 = vld [vmem:[#allocation5 + $0x100] ss:$16 sps:$4 sm:$0xff]  }
  0x67   :  { %v2745_v35 = vld [vmem:[#allocation5 + $0x108] ss:$16 sps:$4 sm:$0xff]   ;;  %v2746_v36 = vld [vmem:[#allocation5 + $0x124] ss:$16 sps:$4 sm:$0xff]   ;;  %v2748_v37 = vld [vmem:[#allocation5 + $0x12c] ss:$16 sps:$4 sm:$0xff]  }
  0x68   :  { %v2750_v38 = vld [vmem:[#allocation5 + $0x120] ss:$16 sps:$4 sm:$0xff]   ;;  %v2751_v39 = vld [vmem:[#allocation5 + $0x128] ss:$16 sps:$4 sm:$0xff]   ;;  %v2752_v40 = vld [vmem:[#allocation5 + $0x144] ss:$16 sps:$4 sm:$0xff]  }
  0x69   :  { %1332 = vmatpush1.bf16.msra.mxu0 %v2714_v14  ;;  %1504 = vmatpush1.bf16.msra.mxu1 %v2715_v15  ;;  %v2754_v41 = vld [vmem:[#allocation5 + $0x14c] ss:$16 sps:$4 sm:$0xff]   ;;  %v2756_v42 = vld [vmem:[#allocation5 + $0x140] ss:$16 sps:$4 sm:$0xff]   ;;  %v2757_v43 = vld [vmem:[#allocation5 + $0x148] ss:$16 sps:$4 sm:$0xff]  }
  0x6a   :  { %1333 = vmatprep.subr.bf16.mxu0 %v2716_v16  ;;  %1505 = vmatprep.subr.bf16.mxu1 %v2718_v17  ;;  %v2758_v44 = vld [vmem:[#allocation5 + $0x164] ss:$16 sps:$4 sm:$0xff]   ;;  %v2760_v45 = vld [vmem:[#allocation5 + $0x16c] ss:$16 sps:$4 sm:$0xff]   ;;  %v2762_v48 = vld [vmem:[#allocation5 + $0x160] ss:$16 sps:$4 sm:$0xff]  }
  0x6b   :  { %v103_v46 = vld [vmem:[#allocation2 + $0x8] sm:$0xff]  ;;  %v110_v47 = vld [vmem:[#allocation2 + $0x40] sm:$0xff]  ;;  %v109_v5 = vld [vmem:[#allocation2 + $0x38] sm:$0xff]  ;;  %vm1321_vm0 = vcmask 130048   ;;  %vm3187_vm1 = vmmov 0   ;;  %s3188_s15 = smov [#allocation11]  }
  0x6c   :  { %v2763_v49 = vld [vmem:[#allocation5 + $0x168] ss:$16 sps:$4 sm:$0xff]   ;;  %v117_v50 = vpack.c.bf16 %v110_v47, %v103_v46  ;;  %v2764_v51 = vld [vmem:[#allocation5 + $0x184] ss:$16 sps:$4 sm:$0xff]   ;;  %v2766_v52 = vld [vmem:[#allocation5 + $0x18c] ss:$16 sps:$4 sm:$0xff]  }
  0x6d   :  { %1334 = vmatpush1.bf16.msra.mxu0 %v2720_v18  ;;  %1506 = vmatpush1.bf16.msra.mxu1 %v2721_v19  ;;  %v2768_v53 = vld [vmem:[#allocation5 + $0x180] ss:$16 sps:$4 sm:$0xff]   ;;  %v2769_v54 = vld [vmem:[#allocation5 + $0x188] ss:$16 sps:$4 sm:$0xff]   ;;  %v2770_v55 = vld [vmem:[#allocation5 + $0x1a4] ss:$16 sps:$4 sm:$0xff]  }
  0x6e   :  { %1335 = vmatprep.subr.bf16.mxu0 %v2722_v20  ;;  %1507 = vmatprep.subr.bf16.mxu1 %v2724_v21  ;;  %v2772_v56 = vld [vmem:[#allocation5 + $0x1ac] ss:$16 sps:$4 sm:$0xff]   ;;  %v2774_v57 = vld [vmem:[#allocation5 + $0x1a0] ss:$16 sps:$4 sm:$0xff]   ;;  %v2775_v58 = vld [vmem:[#allocation5 + $0x1a8] ss:$16 sps:$4 sm:$0xff]  }
  0x6f   :  { %1357 = vmatprep.mubr.bf16.mxu0 %v117_v50  ;;  %1529 = vmatprep.mubr.bf16.mxu1 %v117_v50  ;;  %v2776_v59 = vld [vmem:[#allocation5 + $0x1c4] ss:$16 sps:$4 sm:$0xff]   ;;  %v2778_v60 = vld [vmem:[#allocation5 + $0x1cc] ss:$16 sps:$4 sm:$0xff]   ;;  %v2780_v61 = vld [vmem:[#allocation5 + $0x1c0] ss:$16 sps:$4 sm:$0xff]  }
  0x70   :  { %v2781_v62 = vld [vmem:[#allocation5 + $0x1c8] ss:$16 sps:$4 sm:$0xff]   ;;  %v2782_v63 = vld [vmem:[#allocation5 + $0x1e4] ss:$16 sps:$4 sm:$0xff]   ;;  %v2784_v0 = vld [vmem:[#allocation5 + $0x1ec] ss:$16 sps:$4 sm:$0xff]  }
  0x71   :  { %1336 = vmatpush1.bf16.msra.mxu0 %v2726_v22  ;;  %1508 = vmatpush1.bf16.msra.mxu1 %v2727_v23  ;;  %v2786_v1 = vld [vmem:[#allocation5 + $0x1e0] ss:$16 sps:$4 sm:$0xff]   ;;  %v2787_v2 = vld [vmem:[#allocation5 + $0x1e8] ss:$16 sps:$4 sm:$0xff]   ;;  %v2790_v3 = vld [vmem:[#allocation5 + $0x204] ss:$16 sps:$4 sm:$0xff]  }
  0x72   :  { %1337 = vmatprep.subr.bf16.mxu0 %v2728_v24  ;;  %1509 = vmatprep.subr.bf16.mxu1 %v2730_v25  ;;  %v102_v4 = vld [vmem:[#allocation2] sm:$0xff]  ;;  %v2793_v6 = vld [vmem:[#allocation5 + $0x20c] ss:$16 sps:$4 sm:$0xff]   ;;  %v2791_v8 = vld [vmem:[#allocation5 + $0x208] ss:$16 sps:$4 sm:$0xff]   ;;  %s2271_s16 = sshll.u32 %s3188_s15, 4  ;;  %s2272_s16 = int_to_ptr.vmem [resolvable:$true] %s2271_s16 }
  0x73   :  { %v2788_v7 = vld [vmem:[#allocation5 + $0x200] ss:$16 sps:$4 sm:$0xff]   ;;  %v116_v9 = vpack.c.bf16 %v109_v5, %v102_v4  ;;  %v2796_v10 = vld [vmem:[#allocation5 + $0x224] ss:$16 sps:$4 sm:$0xff]   ;;  %v2799_v11 = vld [vmem:[#allocation5 + $0x22c] ss:$16 sps:$4 sm:$0xff]   ;;  %p3149_p13 = scmp.lt.s32.totalorder %s2272_s16, %s2272_s16 }
  0x74   :  { %v2794_v12 = vld [vmem:[#allocation5 + $0x220] ss:$16 sps:$4 sm:$0xff]   ;;  %v2797_v13 = vld [vmem:[#allocation5 + $0x228] ss:$16 sps:$4 sm:$0xff]   ;;  %v2802_v14 = vld [vmem:[#allocation5 + $0x244] ss:$16 sps:$4 sm:$0xff]  }
  0x75   :  { %1338 = vmatpush1.bf16.msra.mxu0 %v2732_v26  ;;  %1510 = vmatpush1.bf16.msra.mxu1 %v2733_v27  ;;  %v2805_v15 = vld [vmem:[#allocation5 + $0x24c] ss:$16 sps:$4 sm:$0xff]   ;;  %v2800_v16 = vld [vmem:[#allocation5 + $0x240] ss:$16 sps:$4 sm:$0xff]   ;;  %v2803_v17 = vld [vmem:[#allocation5 + $0x248] ss:$16 sps:$4 sm:$0xff]  }
  0x76   :  { %1339 = vmatprep.subr.bf16.mxu0 %v2734_v28  ;;  %1511 = vmatprep.subr.bf16.mxu1 %v2736_v29  ;;  %v2808_v18 = vld [vmem:[#allocation5 + $0x264] ss:$16 sps:$4 sm:$0xff]   ;;  %v2811_v19 = vld [vmem:[#allocation5 + $0x26c] ss:$16 sps:$4 sm:$0xff]   ;;  %v2806_v20 = vld [vmem:[#allocation5 + $0x260] ss:$16 sps:$4 sm:$0xff]  }
  0x77   :  { %v2809_v21 = vld [vmem:[#allocation5 + $0x268] ss:$16 sps:$4 sm:$0xff]   ;;  %v2814_v22 = vld [vmem:[#allocation5 + $0x284] ss:$16 sps:$4 sm:$0xff]   ;;  %v2817_v23 = vld [vmem:[#allocation5 + $0x28c] ss:$16 sps:$4 sm:$0xff]  }
  0x78   :  { %v2812_v24 = vld [vmem:[#allocation5 + $0x280] ss:$16 sps:$4 sm:$0xff]   ;;  %v2815_v25 = vld [vmem:[#allocation5 + $0x288] ss:$16 sps:$4 sm:$0xff]   ;;  %v2820_v26 = vld [vmem:[#allocation5 + $0x2a4] ss:$16 sps:$4 sm:$0xff]  }
  0x79   :  { %1340 = vmatpush1.bf16.msra.mxu0 %v2738_v30  ;;  %1512 = vmatpush1.bf16.msra.mxu1 %v2739_v31  ;;  %v2823_v27 = vld [vmem:[#allocation5 + $0x2ac] ss:$16 sps:$4 sm:$0xff]   ;;  %v2818_v28 = vld [vmem:[#allocation5 + $0x2a0] ss:$16 sps:$4 sm:$0xff]   ;;  %v2821_v29 = vld [vmem:[#allocation5 + $0x2a8] ss:$16 sps:$4 sm:$0xff]  }
  0x7a   :  { %1341 = vmatprep.subr.bf16.mxu0 %v2740_v32  ;;  %1513 = vmatprep.subr.bf16.mxu1 %v2742_v33  ;;  %v2826_v30 = vld [vmem:[#allocation5 + $0x2c4] ss:$16 sps:$4 sm:$0xff]   ;;  %v2829_v31 = vld [vmem:[#allocation5 + $0x2cc] ss:$16 sps:$4 sm:$0xff]   ;;  %v2842_v47 = vld [vmem:[#allocation5 + $0x320] ss:$16 sps:$4 sm:$0xff]  }
  0x7b   :  { %v105_v32 = vld [vmem:[#allocation2 + $0x18] sm:$0xff]  ;;  %v112_v33 = vld [vmem:[#allocation2 + $0x50] sm:$0xff] }
  0x7c   :  { %v2847_v46 = vld [vmem:[#allocation5 + $0x32c] ss:$16 sps:$4 sm:$0xff]   ;;  %v2875_v4 = vld [vmem:[#allocation5 + $0x3c8] ss:$16 sps:$4 sm:$0xff]   ;;  %v2880_v5 = vld [vmem:[#allocation5 + $0x3e4] ss:$16 sps:$4 sm:$0xff]  }
  0x7d   :  { %1342 = vmatpush1.bf16.msra.mxu0 %v2744_v34  ;;  %1514 = vmatpush1.bf16.msra.mxu1 %v2745_v35  ;;  %v2824_v34 = vld [vmem:[#allocation5 + $0x2c0] ss:$16 sps:$4 sm:$0xff]   ;;  %v2827_v35 = vld [vmem:[#allocation5 + $0x2c8] ss:$16 sps:$4 sm:$0xff]   ;;  %v2853_v50 = vld [vmem:[#allocation5 + $0x34c] ss:$16 sps:$4 sm:$0xff]  }
  0x7e   :  { %1343 = vmatprep.subr.bf16.mxu0 %v2746_v36  ;;  %1515 = vmatprep.subr.bf16.mxu1 %v2748_v37  ;;  %v119_v36 = vpack.c.bf16 %v112_v33, %v105_v32  ;;  %v2832_v37 = vld [vmem:[#allocation5 + $0x2e4] ss:$16 sps:$4 sm:$0xff]   ;;  %v2913_v32 = vld [vmem:[#allocation5 + $0x48c] ss:$16 sps:$4 sm:$0xff]   ;;  %v2908_v33 = vld [vmem:[#allocation5 + $0x480] ss:$16 sps:$4 sm:$0xff]  }
  0x81   :  { %1344 = vmatpush1.bf16.msra.mxu0 %v2750_v38  ;;  %1516 = vmatpush1.bf16.msra.mxu1 %v2751_v39  ;;  %v2835_v38 = vld [vmem:[#allocation5 + $0x2ec] ss:$16 sps:$4 sm:$0xff]   ;;  %v2830_v39 = vld [vmem:[#allocation5 + $0x2e0] ss:$16 sps:$4 sm:$0xff]  }
  0x82   :  { %1345 = vmatprep.subr.bf16.mxu0 %v2752_v40  ;;  %1517 = vmatprep.subr.bf16.mxu1 %v2754_v41  ;;  %v2833_v40 = vld [vmem:[#allocation5 + $0x2e8] ss:$16 sps:$4 sm:$0xff]   ;;  %v2838_v41 = vld [vmem:[#allocation5 + $0x304] ss:$16 sps:$4 sm:$0xff]  }
  0x85   :  { %1346 = vmatpush1.bf16.msra.mxu0 %v2756_v42  ;;  %1518 = vmatpush1.bf16.msra.mxu1 %v2757_v43  ;;  %v2841_v42 = vld [vmem:[#allocation5 + $0x30c] ss:$16 sps:$4 sm:$0xff]   ;;  %v2836_v43 = vld [vmem:[#allocation5 + $0x300] ss:$16 sps:$4 sm:$0xff]  }
  0x86   :  { %1347 = vmatprep.subr.bf16.mxu0 %v2758_v44  ;;  %1519 = vmatprep.subr.bf16.mxu1 %v2760_v45  ;;  %v2839_v44 = vld [vmem:[#allocation5 + $0x308] ss:$16 sps:$4 sm:$0xff]   ;;  %v2844_v45 = vld [vmem:[#allocation5 + $0x324] ss:$16 sps:$4 sm:$0xff]  }
  0x89   :  { %1348 = vmatpush1.bf16.msra.mxu0 %v2762_v48  ;;  %1520 = vmatpush1.bf16.msra.mxu1 %v2763_v49  ;;  %v2845_v48 = vld [vmem:[#allocation5 + $0x328] ss:$16 sps:$4 sm:$0xff]   ;;  %v2850_v49 = vld [vmem:[#allocation5 + $0x344] ss:$16 sps:$4 sm:$0xff]  }
  0x8a   :  { %1349 = vmatprep.subr.bf16.mxu0 %v2764_v51  ;;  %1521 = vmatprep.subr.bf16.mxu1 %v2766_v52  ;;  %v2848_v51 = vld [vmem:[#allocation5 + $0x340] ss:$16 sps:$4 sm:$0xff]   ;;  %v2851_v52 = vld [vmem:[#allocation5 + $0x348] ss:$16 sps:$4 sm:$0xff]  }
  0x8d   :  { %1350 = vmatpush1.bf16.msra.mxu0 %v2768_v53  ;;  %1522 = vmatpush1.bf16.msra.mxu1 %v2769_v54  ;;  %v2856_v53 = vld [vmem:[#allocation5 + $0x364] ss:$16 sps:$4 sm:$0xff]   ;;  %v2859_v54 = vld [vmem:[#allocation5 + $0x36c] ss:$16 sps:$4 sm:$0xff]  }
  0x8e   :  { %1351 = vmatprep.subr.bf16.mxu0 %v2770_v55  ;;  %1523 = vmatprep.subr.bf16.mxu1 %v2772_v56  ;;  %v2854_v55 = vld [vmem:[#allocation5 + $0x360] ss:$16 sps:$4 sm:$0xff]   ;;  %v2857_v56 = vld [vmem:[#allocation5 + $0x368] ss:$16 sps:$4 sm:$0xff]  }
  0x91   :  { %1352 = vmatpush1.bf16.msra.mxu0 %v2774_v57  ;;  %1524 = vmatpush1.bf16.msra.mxu1 %v2775_v58  ;;  %v2862_v57 = vld [vmem:[#allocation5 + $0x384] ss:$16 sps:$4 sm:$0xff]   ;;  %v2865_v58 = vld [vmem:[#allocation5 + $0x38c] ss:$16 sps:$4 sm:$0xff]  }
  0x92   :  { %1353 = vmatprep.subr.bf16.mxu0 %v2776_v59  ;;  %1525 = vmatprep.subr.bf16.mxu1 %v2778_v60  ;;  %v2860_v59 = vld [vmem:[#allocation5 + $0x380] ss:$16 sps:$4 sm:$0xff]   ;;  %v2863_v60 = vld [vmem:[#allocation5 + $0x388] ss:$16 sps:$4 sm:$0xff]  }
  0x95   :  { %1354 = vmatpush1.bf16.msra.mxu0 %v2780_v61  ;;  %1526 = vmatpush1.bf16.msra.mxu1 %v2781_v62  ;;  %v2868_v61 = vld [vmem:[#allocation5 + $0x3a4] ss:$16 sps:$4 sm:$0xff]   ;;  %v2871_v62 = vld [vmem:[#allocation5 + $0x3ac] ss:$16 sps:$4 sm:$0xff]  }
  0x96   :  { %1355 = vmatprep.subr.bf16.mxu0 %v2782_v63  ;;  %1527 = vmatprep.subr.bf16.mxu1 %v2784_v0  ;;  %v2866_v63 = vld [vmem:[#allocation5 + $0x3a0] ss:$16 sps:$4 sm:$0xff]   ;;  %v2869_v0 = vld [vmem:[#allocation5 + $0x3a8] ss:$16 sps:$4 sm:$0xff]  }
  0x99   :  { %1356 = vmatpush1.bf16.msra.mxu0 %v2786_v1  ;;  %1528 = vmatpush1.bf16.msra.mxu1 %v2787_v2  ;;  %v2874_v1 = vld [vmem:[#allocation5 + $0x3c4] ss:$16 sps:$4 sm:$0xff]   ;;  %v2877_v2 = vld [vmem:[#allocation5 + $0x3cc] ss:$16 sps:$4 sm:$0xff]  }
  0x9a   :  { %1368 = vmatprep.subr.bf16.mxu0 %v2790_v3  ;;  %1540 = vmatprep.subr.bf16.mxu1 %v2793_v6  ;;  %v2872_v3 = vld [vmem:[#allocation5 + $0x3c0] ss:$16 sps:$4 sm:$0xff]   ;;  %v2883_v6 = vld [vmem:[#allocation5 + $0x3ec] ss:$16 sps:$4 sm:$0xff]  }
  0x9c   :  { %1358 = vmatmul.mubr.bf16.vlgmr.msra.gmra.mrb[0].mxu0 %v116_v9  ;;  %1530 = vmatmul.mubr.bf16.vlgmr.msra.gmra.mrb[0].mxu1 %v116_v9  ;;  %v2886_v9 = vld [vmem:[#allocation5 + $0x404] ss:$16 sps:$4 sm:$0xff]  }
  0x9d   :  { %1369 = vmatpush1.bf16.msra.mxu0 %v2788_v7  ;;  %1541 = vmatpush1.bf16.msra.mxu1 %v2791_v8  ;;  %v2878_v7 = vld [vmem:[#allocation5 + $0x3e0] ss:$16 sps:$4 sm:$0xff]   ;;  %v2881_v8 = vld [vmem:[#allocation5 + $0x3e8] ss:$16 sps:$4 sm:$0xff]  }
  0x9e   :  { %1370 = vmatprep.subr.bf16.mxu0 %v2796_v10  ;;  %1542 = vmatprep.subr.bf16.mxu1 %v2799_v11  ;;  %v104_v10 = vld [vmem:[#allocation2 + $0x10] sm:$0xff]  ;;  %v111_v11 = vld [vmem:[#allocation2 + $0x48] sm:$0xff] }
  0x9f   :  { %1400 = vmatprep.mubr.bf16.mxu0 %v119_v36  ;;  %1572 = vmatprep.mubr.bf16.mxu1 %v119_v36  ;;  %v2919_v36 = vld [vmem:[#allocation5 + $0x4ac] ss:$16 sps:$4 sm:$0xff]  }
  0xa1   :  { %1371 = vmatpush1.bf16.msra.mxu0 %v2794_v12  ;;  %1543 = vmatpush1.bf16.msra.mxu1 %v2797_v13  ;;  %v2889_v12 = vld [vmem:[#allocation5 + $0x40c] ss:$16 sps:$4 sm:$0xff]   ;;  %v2884_v13 = vld [vmem:[#allocation5 + $0x400] ss:$16 sps:$4 sm:$0xff]  }
  0xa2   :  { %1372 = vmatprep.subr.bf16.mxu0 %v2802_v14  ;;  %1544 = vmatprep.subr.bf16.mxu1 %v2805_v15  ;;  %v2887_v14 = vld [vmem:[#allocation5 + $0x408] ss:$16 sps:$4 sm:$0xff]   ;;  %v118_v15 = vpack.c.bf16 %v111_v11, %v104_v10  ;;  %v2976_v11 = vld [vmem:[#allocation5 + $0x5e4] ss:$16 sps:$4 sm:$0xff]  }
  0xa3   :  { %v2971_v10 = vld [vmem:[#allocation5 + $0x5c8] ss:$16 sps:$4 sm:$0xff]  }
  0xa5   :  { %1373 = vmatpush1.bf16.msra.mxu0 %v2800_v16  ;;  %1545 = vmatpush1.bf16.msra.mxu1 %v2803_v17  ;;  %v2892_v16 = vld [vmem:[#allocation5 + $0x424] ss:$16 sps:$4 sm:$0xff]   ;;  %v2895_v17 = vld [vmem:[#allocation5 + $0x42c] ss:$16 sps:$4 sm:$0xff]  }
  0xa6   :  { %1374 = vmatprep.subr.bf16.mxu0 %v2808_v18  ;;  %1546 = vmatprep.subr.bf16.mxu1 %v2811_v19  ;;  %v107_v18 = vld [vmem:[#allocation2 + $0x28] sm:$0xff]  ;;  %v2890_v19 = vld [vmem:[#allocation5 + $0x420] ss:$16 sps:$4 sm:$0xff]  }
  0xa9   :  { %1375 = vmatpush1.bf16.msra.mxu0 %v2806_v20  ;;  %1547 = vmatpush1.bf16.msra.mxu1 %v2809_v21  ;;  %v2893_v20 = vld [vmem:[#allocation5 + $0x428] ss:$16 sps:$4 sm:$0xff]   ;;  %v114_v21 = vld [vmem:[#allocation2 + $0x60] sm:$0xff] }
  0xaa   :  { %1376 = vmatprep.subr.bf16.mxu0 %v2814_v22  ;;  %1548 = vmatprep.subr.bf16.mxu1 %v2817_v23  ;;  %v2898_v22 = vld [vmem:[#allocation5 + $0x444] ss:$16 sps:$4 sm:$0xff]   ;;  %v121_v23 = vpack.c.bf16 %v114_v21, %v107_v18  ;;  %v2985_v18 = vld [vmem:[#allocation5 + $0x60c] ss:$16 sps:$4 sm:$0xff]   ;;  %v2983_v21 = vld [vmem:[#allocation5 + $0x608] ss:$16 sps:$4 sm:$0xff]  }
  0xad   :  { %1377 = vmatpush1.bf16.msra.mxu0 %v2812_v24  ;;  %1549 = vmatpush1.bf16.msra.mxu1 %v2815_v25  ;;  %v2901_v24 = vld [vmem:[#allocation5 + $0x44c] ss:$16 sps:$4 sm:$0xff]   ;;  %v2896_v25 = vld [vmem:[#allocation5 + $0x440] ss:$16 sps:$4 sm:$0xff]  }
  0xae   :  { %1378 = vmatprep.subr.bf16.mxu0 %v2820_v26  ;;  %1550 = vmatprep.subr.bf16.mxu1 %v2823_v27  ;;  %v2899_v26 = vld [vmem:[#allocation5 + $0x448] ss:$16 sps:$4 sm:$0xff]   ;;  %v2904_v27 = vld [vmem:[#allocation5 + $0x464] ss:$16 sps:$4 sm:$0xff]  }
  0xb1   :  { %1379 = vmatpush1.bf16.msra.mxu0 %v2818_v28  ;;  %1551 = vmatpush1.bf16.msra.mxu1 %v2821_v29  ;;  %v2907_v28 = vld [vmem:[#allocation5 + $0x46c] ss:$16 sps:$4 sm:$0xff]   ;;  %v2902_v29 = vld [vmem:[#allocation5 + $0x460] ss:$16 sps:$4 sm:$0xff]  }
  0xb2   :  { %1380 = vmatprep.subr.bf16.mxu0 %v2826_v30  ;;  %1552 = vmatprep.subr.bf16.mxu1 %v2829_v31  ;;  %v2905_v30 = vld [vmem:[#allocation5 + $0x468] ss:$16 sps:$4 sm:$0xff]   ;;  %v2910_v31 = vld [vmem:[#allocation5 + $0x484] ss:$16 sps:$4 sm:$0xff]  }
  0xb5   :  { %1381 = vmatpush1.bf16.msra.mxu0 %v2824_v34  ;;  %1553 = vmatpush1.bf16.msra.mxu1 %v2827_v35  ;;  %v2911_v34 = vld [vmem:[#allocation5 + $0x488] ss:$16 sps:$4 sm:$0xff]   ;;  %v2916_v35 = vld [vmem:[#allocation5 + $0x4a4] ss:$16 sps:$4 sm:$0xff]  }
  0xb6   :  { %1382 = vmatprep.subr.bf16.mxu0 %v2832_v37  ;;  %1554 = vmatprep.subr.bf16.mxu1 %v2835_v38  ;;  %v2914_v37 = vld [vmem:[#allocation5 + $0x4a0] ss:$16 sps:$4 sm:$0xff]   ;;  %v2917_v38 = vld [vmem:[#allocation5 + $0x4a8] ss:$16 sps:$4 sm:$0xff]  }
  0xb9   :  { %1383 = vmatpush1.bf16.msra.mxu0 %v2830_v39  ;;  %1555 = vmatpush1.bf16.msra.mxu1 %v2833_v40  ;;  %v2922_v39 = vld [vmem:[#allocation5 + $0x4c4] ss:$16 sps:$4 sm:$0xff]   ;;  %v2925_v40 = vld [vmem:[#allocation5 + $0x4cc] ss:$16 sps:$4 sm:$0xff]  }
  0xba   :  { %1384 = vmatprep.subr.bf16.mxu0 %v2838_v41  ;;  %1556 = vmatprep.subr.bf16.mxu1 %v2841_v42  ;;  %v2920_v41 = vld [vmem:[#allocation5 + $0x4c0] ss:$16 sps:$4 sm:$0xff]   ;;  %v2923_v42 = vld [vmem:[#allocation5 + $0x4c8] ss:$16 sps:$4 sm:$0xff]  }
  0xbd   :  { %1385 = vmatpush1.bf16.msra.mxu0 %v2836_v43  ;;  %1557 = vmatpush1.bf16.msra.mxu1 %v2839_v44  ;;  %v2928_v43 = vld [vmem:[#allocation5 + $0x4e4] ss:$16 sps:$4 sm:$0xff]   ;;  %v2931_v44 = vld [vmem:[#allocation5 + $0x4ec] ss:$16 sps:$4 sm:$0xff]  }
  0xbe   :  { %1386 = vmatprep.subr.bf16.mxu0 %v2844_v45  ;;  %1558 = vmatprep.subr.bf16.mxu1 %v2847_v46  ;;  %v2926_v45 = vld [vmem:[#allocation5 + $0x4e0] ss:$16 sps:$4 sm:$0xff]   ;;  %v2929_v46 = vld [vmem:[#allocation5 + $0x4e8] ss:$16 sps:$4 sm:$0xff]  }
  0xc1   :  { %1387 = vmatpush1.bf16.msra.mxu0 %v2842_v47  ;;  %1559 = vmatpush1.bf16.msra.mxu1 %v2845_v48  ;;  %v2934_v47 = vld [vmem:[#allocation5 + $0x504] ss:$16 sps:$4 sm:$0xff]   ;;  %v2937_v48 = vld [vmem:[#allocation5 + $0x50c] ss:$16 sps:$4 sm:$0xff]  }
  0xc2   :  { %1388 = vmatprep.subr.bf16.mxu0 %v2850_v49  ;;  %1560 = vmatprep.subr.bf16.mxu1 %v2853_v50  ;;  %v2932_v49 = vld [vmem:[#allocation5 + $0x500] ss:$16 sps:$4 sm:$0xff]   ;;  %v2935_v50 = vld [vmem:[#allocation5 + $0x508] ss:$16 sps:$4 sm:$0xff]  }
  0xc5   :  { %1389 = vmatpush1.bf16.msra.mxu0 %v2848_v51  ;;  %1561 = vmatpush1.bf16.msra.mxu1 %v2851_v52  ;;  %v2940_v51 = vld [vmem:[#allocation5 + $0x524] ss:$16 sps:$4 sm:$0xff]   ;;  %v2943_v52 = vld [vmem:[#allocation5 + $0x52c] ss:$16 sps:$4 sm:$0xff]  }
  0xc6   :  { %1390 = vmatprep.subr.bf16.mxu0 %v2856_v53  ;;  %1562 = vmatprep.subr.bf16.mxu1 %v2859_v54  ;;  %v2938_v53 = vld [vmem:[#allocation5 + $0x520] ss:$16 sps:$4 sm:$0xff]   ;;  %v2941_v54 = vld [vmem:[#allocation5 + $0x528] ss:$16 sps:$4 sm:$0xff]  }
  0xc9   :  { %1391 = vmatpush1.bf16.msra.mxu0 %v2854_v55  ;;  %1563 = vmatpush1.bf16.msra.mxu1 %v2857_v56  ;;  %v2946_v55 = vld [vmem:[#allocation5 + $0x544] ss:$16 sps:$4 sm:$0xff]   ;;  %v2949_v56 = vld [vmem:[#allocation5 + $0x54c] ss:$16 sps:$4 sm:$0xff]  }
  0xca   :  { %1392 = vmatprep.subr.bf16.mxu0 %v2862_v57  ;;  %1564 = vmatprep.subr.bf16.mxu1 %v2865_v58  ;;  %v2944_v57 = vld [vmem:[#allocation5 + $0x540] ss:$16 sps:$4 sm:$0xff]   ;;  %v2947_v58 = vld [vmem:[#allocation5 + $0x548] ss:$16 sps:$4 sm:$0xff]  }
  0xcd   :  { %1393 = vmatpush1.bf16.msra.mxu0 %v2860_v59  ;;  %1565 = vmatpush1.bf16.msra.mxu1 %v2863_v60  ;;  %v2952_v59 = vld [vmem:[#allocation5 + $0x564] ss:$16 sps:$4 sm:$0xff]   ;;  %v2955_v60 = vld [vmem:[#allocation5 + $0x56c] ss:$16 sps:$4 sm:$0xff]  }
  0xce   :  { %1394 = vmatprep.subr.bf16.mxu0 %v2868_v61  ;;  %1566 = vmatprep.subr.bf16.mxu1 %v2871_v62  ;;  %v2950_v61 = vld [vmem:[#allocation5 + $0x560] ss:$16 sps:$4 sm:$0xff]   ;;  %v2953_v62 = vld [vmem:[#allocation5 + $0x568] ss:$16 sps:$4 sm:$0xff]  }
  0xd1   :  { %1395 = vmatpush1.bf16.msra.mxu0 %v2866_v63  ;;  %1567 = vmatpush1.bf16.msra.mxu1 %v2869_v0  ;;  %v2958_v63 = vld [vmem:[#allocation5 + $0x584] ss:$16 sps:$4 sm:$0xff]   ;;  %v2961_v0 = vld [vmem:[#allocation5 + $0x58c] ss:$16 sps:$4 sm:$0xff]  }
  0xd2   :  { %1396 = vmatprep.subr.bf16.mxu0 %v2874_v1  ;;  %1568 = vmatprep.subr.bf16.mxu1 %v2877_v2  ;;  %v2956_v1 = vld [vmem:[#allocation5 + $0x580] ss:$16 sps:$4 sm:$0xff]   ;;  %v2959_v2 = vld [vmem:[#allocation5 + $0x588] ss:$16 sps:$4 sm:$0xff]  }
  0xd5   :  { %1397 = vmatpush1.bf16.msra.mxu0 %v2872_v3  ;;  %1569 = vmatpush1.bf16.msra.mxu1 %v2875_v4  ;;  %v2964_v3 = vld [vmem:[#allocation5 + $0x5a4] ss:$16 sps:$4 sm:$0xff]   ;;  %v2967_v4 = vld [vmem:[#allocation5 + $0x5ac] ss:$16 sps:$4 sm:$0xff]  }
  0xd6   :  { %1398 = vmatprep.subr.bf16.mxu0 %v2880_v5  ;;  %1570 = vmatprep.subr.bf16.mxu1 %v2883_v6  ;;  %v2962_v5 = vld [vmem:[#allocation5 + $0x5a0] ss:$16 sps:$4 sm:$0xff]   ;;  %v2965_v6 = vld [vmem:[#allocation5 + $0x5a8] ss:$16 sps:$4 sm:$0xff]  }
  0xd9   :  { %1399 = vmatpush1.bf16.msra.mxu0 %v2878_v7  ;;  %1571 = vmatpush1.bf16.msra.mxu1 %v2881_v8  ;;  %v2970_v7 = vld [vmem:[#allocation5 + $0x5c4] ss:$16 sps:$4 sm:$0xff]   ;;  %v2973_v8 = vld [vmem:[#allocation5 + $0x5cc] ss:$16 sps:$4 sm:$0xff]  }
  0xda   :  { %1411 = vmatprep.subr.bf16.mxu0 %v2886_v9  ;;  %1583 = vmatprep.subr.bf16.mxu1 %v2889_v12  ;;  %v2968_v9 = vld [vmem:[#allocation5 + $0x5c0] ss:$16 sps:$4 sm:$0xff]   ;;  %v2979_v12 = vld [vmem:[#allocation5 + $0x5ec] ss:$16 sps:$4 sm:$0xff]  }
  0xdc   :  { %1401 = vmatmul.mubr.bf16.vlgmr.msra.gmra.mrb[0].mxu0 %v118_v15  ;;  %1573 = vmatmul.mubr.bf16.vlgmr.msra.gmra.mrb[0].mxu1 %v118_v15  ;;  %v106_v15 = vld [vmem:[#allocation2 + $0x20] sm:$0xff] }
  0xdd   :  { %1412 = vmatpush1.bf16.msra.mxu0 %v2884_v13  ;;  %1584 = vmatpush1.bf16.msra.mxu1 %v2887_v14  ;;  %v2974_v13 = vld [vmem:[#allocation5 + $0x5e0] ss:$16 sps:$4 sm:$0xff]   ;;  %v2977_v14 = vld [vmem:[#allocation5 + $0x5e8] ss:$16 sps:$4 sm:$0xff]  }
  0xde   :  { %1413 = vmatprep.subr.bf16.mxu0 %v2892_v16  ;;  %1585 = vmatprep.subr.bf16.mxu1 %v2895_v17  ;;  %v113_v16 = vld [vmem:[#allocation2 + $0x58] sm:$0xff]  ;;  %v2982_v17 = vld [vmem:[#allocation5 + $0x604] ss:$16 sps:$4 sm:$0xff]  }
  0xdf   :  { %1443 = vmatprep.mubr.bf16.mxu0 %v121_v23  ;;  %1615 = vmatprep.mubr.bf16.mxu1 %v121_v23  ;;  %v2987_v23 = vld [vmem:[#allocation7 + $0xc0] sm:$0xff]  }
  0xe1   :  { %1414 = vmatpush1.bf16.msra.mxu0 %v2890_v19  ;;  %1586 = vmatpush1.bf16.msra.mxu1 %v2893_v20  ;;  %v120_v19 = vpack.c.bf16 %v113_v16, %v106_v15  ;;  %v2980_v20 = vld [vmem:[#allocation5 + $0x600] ss:$16 sps:$4 sm:$0xff]  }
  0xe2   :  { %1415 = vmatprep.subr.bf16.mxu0 %v2898_v22  ;;  %1587 = vmatprep.subr.bf16.mxu1 %v2901_v24  ;;  %v2986_v22 = vld [vmem:[#allocation7 + $0x40] sm:$0xff]   ;;  %v3185_v24 = vmov 0  }
  0xe5   :  { %1416 = vmatpush1.bf16.msra.mxu0 %v2896_v25  ;;  %1588 = vmatpush1.bf16.msra.mxu1 %v2899_v26  ;;  %v108_v25 = vld [vmem:[#allocation2 + $0x30] sm:$0xff]  ;;  %v115_v26 = vld [vmem:[#allocation2 + $0x68] sm:$0xff] }
  0xe6   :  { %1417 = vmatprep.subr.bf16.mxu0 %v2904_v27  ;;  %1589 = vmatprep.subr.bf16.mxu1 %v2907_v28  ;;  %v122_v27 = vpack.c.bf16 %v115_v26, %v108_v25  ;;  %v2988_v28 = vld [vmem:[#allocation7] sm:$0xff]  }
  0xe9   :  { %1418 = vmatpush1.bf16.msra.mxu0 %v2902_v29  ;;  %1590 = vmatpush1.bf16.msra.mxu1 %v2905_v30  ;;  %v2989_v29 = vld [vmem:[#allocation7 + $0x80] sm:$0xff]   ;;  %v2990_v30 = vld [vmem:[#allocation7 + $0x48] sm:$0xff]  }
  0xea   :  { %1419 = vmatprep.subr.bf16.mxu0 %v2910_v31  ;;  %1591 = vmatprep.subr.bf16.mxu1 %v2913_v32  ;;  %v2991_v31 = vld [vmem:[#allocation7 + $0xc8] sm:$0xff]  }
  0xeb   :  { %v2992_v32 = vld [vmem:[#allocation7 + $0x8] sm:$0xff]  }
  0xed   :  { %1420 = vmatpush1.bf16.msra.mxu0 %v2908_v33  ;;  %1592 = vmatpush1.bf16.msra.mxu1 %v2911_v34  ;;  %v2993_v33 = vld [vmem:[#allocation7 + $0x88] sm:$0xff]   ;;  %v2994_v34 = vld [vmem:[#allocation7 + $0x50] sm:$0xff]  }
  0xee   :  { %1421 = vmatprep.subr.bf16.mxu0 %v2916_v35  ;;  %1593 = vmatprep.subr.bf16.mxu1 %v2919_v36  ;;  %v2995_v35 = vld [vmem:[#allocation7 + $0xd0] sm:$0xff]  }
  0xef   :  { %v2996_v36 = vld [vmem:[#allocation7 + $0x10] sm:$0xff]  }
  0xf1   :  { %1422 = vmatpush1.bf16.msra.mxu0 %v2914_v37  ;;  %1594 = vmatpush1.bf16.msra.mxu1 %v2917_v38  ;;  %v2997_v37 = vld [vmem:[#allocation7 + $0x90] sm:$0xff]   ;;  %v2998_v38 = vld [vmem:[#allocation7 + $0x58] sm:$0xff]  }
  0xf2   :  { %1423 = vmatprep.subr.bf16.mxu0 %v2922_v39  ;;  %1595 = vmatprep.subr.bf16.mxu1 %v2925_v40  ;;  %v2999_v39 = vld [vmem:[#allocation7 + $0xd8] sm:$0xff]  }
  0xf3   :  { %v3000_v40 = vld [vmem:[#allocation7 + $0x18] sm:$0xff]  }
  0xf5   :  { %1424 = vmatpush1.bf16.msra.mxu0 %v2920_v41  ;;  %1596 = vmatpush1.bf16.msra.mxu1 %v2923_v42  ;;  %v3001_v41 = vld [vmem:[#allocation7 + $0x98] sm:$0xff]   ;;  %v3002_v42 = vld [vmem:[#allocation7 + $0x60] sm:$0xff]  }
  0xf6   :  { %1425 = vmatprep.subr.bf16.mxu0 %v2928_v43  ;;  %1597 = vmatprep.subr.bf16.mxu1 %v2931_v44  ;;  %v3003_v43 = vld [vmem:[#allocation7 + $0xe0] sm:$0xff]  }
  0xf7   :  { %v3004_v44 = vld [vmem:[#allocation7 + $0x20] sm:$0xff]  }
  0xf9   :  { %1426 = vmatpush1.bf16.msra.mxu0 %v2926_v45  ;;  %1598 = vmatpush1.bf16.msra.mxu1 %v2929_v46  ;;  %v3005_v45 = vld [vmem:[#allocation7 + $0xa0] sm:$0xff]   ;;  %v3006_v46 = vld [vmem:[#allocation7 + $0x68] sm:$0xff]  }
  0xfa   :  { %1427 = vmatprep.subr.bf16.mxu0 %v2934_v47  ;;  %1599 = vmatprep.subr.bf16.mxu1 %v2937_v48  ;;  %v3007_v47 = vld [vmem:[#allocation7 + $0xe8] sm:$0xff]  }
  0xfb   :  { %v3008_v48 = vld [vmem:[#allocation7 + $0x28] sm:$0xff]  }
  0xfd   :  { %1428 = vmatpush1.bf16.msra.mxu0 %v2932_v49  ;;  %1600 = vmatpush1.bf16.msra.mxu1 %v2935_v50  ;;  %v3009_v49 = vld [vmem:[#allocation7 + $0xa8] sm:$0xff]   ;;  %v3010_v50 = vld [vmem:[#allocation7 + $0x70] sm:$0xff]  }
  0xfe   :  { %1429 = vmatprep.subr.bf16.mxu0 %v2940_v51  ;;  %1601 = vmatprep.subr.bf16.mxu1 %v2943_v52  ;;  %v3011_v51 = vld [vmem:[#allocation7 + $0xf0] sm:$0xff]  }
  0xff   :  { %v3012_v52 = vld [vmem:[#allocation7 + $0x30] sm:$0xff]  }
 0x101   :  { %1430 = vmatpush1.bf16.msra.mxu0 %v2938_v53  ;;  %1602 = vmatpush1.bf16.msra.mxu1 %v2941_v54  ;;  %v3013_v53 = vld [vmem:[#allocation7 + $0xb0] sm:$0xff]   ;;  %v3014_v54 = vld [vmem:[#allocation7 + $0x78] sm:$0xff]  }
 0x102   :  { %1431 = vmatprep.subr.bf16.mxu0 %v2946_v55  ;;  %1603 = vmatprep.subr.bf16.mxu1 %v2949_v56  ;;  %v3015_v55 = vld [vmem:[#allocation7 + $0xf8] sm:$0xff]  }
 0x103   :  { %v3016_v56 = vld [vmem:[#allocation7 + $0x38] sm:$0xff]  }
 0x105   :  { %1432 = vmatpush1.bf16.msra.mxu0 %v2944_v57  ;;  %1604 = vmatpush1.bf16.msra.mxu1 %v2947_v58  ;;  %v3017_v57 = vld [vmem:[#allocation7 + $0xb8] sm:$0xff]   ;;  %v3186_v58 = vmov 0.0  }
 0x106   :  { %1433 = vmatprep.subr.bf16.mxu0 %v2952_v59  ;;  %1605 = vmatprep.subr.bf16.mxu1 %v2955_v60  ;;  %v321_v59 = vlaneseq }
 0x108   :  { %v322_v60 = vshrl.u32 %v321_v59, 7 }
 0x109   :  { %1434 = vmatpush1.bf16.msra.mxu0 %v2950_v61  ;;  %1606 = vmatpush1.bf16.msra.mxu1 %v2953_v62 }
 0x10a   :  { %1435 = vmatprep.subr.bf16.mxu0 %v2958_v63  ;;  %1607 = vmatprep.subr.bf16.mxu1 %v2961_v0  ;;  %v323_v61 = vsub.s32 0, %v322_v60  ;;  %v331_v62 = vsub.s32 2, %v322_v60  ;;  %v319_v63 = vld [vmem:[%s3355_s2] sm:$0xf]  ;;  %v327_v0 = vsub.s32 1, %v322_v60 }
 0x10d   :  { %1436 = vmatpush1.bf16.msra.mxu0 %v2956_v1  ;;  %1608 = vmatpush1.bf16.msra.mxu1 %v2959_v2  ;;  %v335_v1 = vsub.s32 3, %v322_v60  ;;  %v324_v2 = vrot.slane %v319_v63, %v323_v61 }
 0x10e   :  { %1437 = vmatprep.subr.bf16.mxu0 %v2964_v3  ;;  %1609 = vmatprep.subr.bf16.mxu1 %v2967_v4  ;;  %v332_v3 = vrot.slane %v319_v63, %v331_v62  ;;  %v328_v4 = vrot.slane %v319_v63, %v327_v0 }
 0x111   :  { %1438 = vmatpush1.bf16.msra.mxu0 %v2962_v5  ;;  %1610 = vmatpush1.bf16.msra.mxu1 %v2965_v6  ;;  %v336_v5 = vrot.slane %v319_v63, %v335_v1 }
 0x112   :  { %1439 = vmatprep.subr.bf16.mxu0 %v2970_v7  ;;  %1611 = vmatprep.subr.bf16.mxu1 %v2973_v8 }
 0x115   :  { %1440 = vmatpush1.bf16.msra.mxu0 %v2968_v9  ;;  %1612 = vmatpush1.bf16.msra.mxu1 %v2971_v10 }
 0x116   :  { %1441 = vmatprep.subr.bf16.mxu0 %v2976_v11  ;;  %1613 = vmatprep.subr.bf16.mxu1 %v2979_v12 }
 0x119   :  { %1442 = vmatpush1.bf16.msra.mxu0 %v2974_v13  ;;  %1614 = vmatpush1.bf16.msra.mxu1 %v2977_v14 }
 0x11a   :  { %1454 = vmatprep.subr.bf16.mxu0 %v2982_v17  ;;  %1626 = vmatprep.subr.bf16.mxu1 %v2985_v18 }
 0x11c   :  { %1444 = vmatmul.mubr.bf16.vlgmr.msra.gmra.mrb[0].mxu0 %v120_v19  ;;  %1616 = vmatmul.mubr.bf16.vlgmr.msra.gmra.mrb[0].mxu1 %v120_v19 }
 0x11d   :  { %1455 = vmatpush1.bf16.msra.mxu0 %v2980_v20  ;;  %1627 = vmatpush1.bf16.msra.mxu1 %v2983_v21 }
 0x11e   :  { %1486 = vmatprep.mubr.bf16.mxu0 %v3185_v24  ;;  %1658 = vmatprep.mubr.bf16.mxu1 %v3185_v24 }
 0x11f   :  { %2543 = vmatprep.subr.bf16.mxu0 %v2986_v22  ;;  %2565 = vmatprep.subr.bf16.mxu1 %v2987_v23 }
 0x128   :  { %2481 = vmatmul.mubr.msk.bf16.vlgmr.msra.gmra.mrb[0].mxu0 %vm1321_vm0, %v122_v27  ;;  %2482 = vmatmul.mubr.msk.bf16.vlgmr.msra.gmra.mrb[0].mxu1 %vm1321_vm0, %v122_v27 }
 0x129   :  { %2544 = vmatpush3.bf16.msra.mxu0 %v2988_v28  ;;  %2566 = vmatpush3.bf16.msra.mxu1 %v2989_v29 }
 0x12a   :  { %2545 = vmatprep.subr.bf16.mxu0 %v2990_v30  ;;  %2567 = vmatprep.subr.bf16.mxu1 %v2991_v31 }
 0x12d   :  { %2546 = vmatpush3.bf16.msra.mxu0 %v2992_v32  ;;  %2568 = vmatpush3.bf16.msra.mxu1 %v2993_v33 }
 0x12e   :  { %2547 = vmatprep.subr.bf16.mxu0 %v2994_v34  ;;  %2569 = vmatprep.subr.bf16.mxu1 %v2995_v35  ;;  %v3018_v34 = vld [vmem:[#allocation8] sm:$0xff]   ;;  %v3019_v35 = vld [vmem:[#allocation8 + $0x8] sm:$0xff]  }
 0x131   :  { %2548 = vmatpush3.bf16.msra.mxu0 %v2996_v36  ;;  %2570 = vmatpush3.bf16.msra.mxu1 %v2997_v37  ;;  %v3020_v36 = vld [vmem:[#allocation8 + $0x10] sm:$0xff]   ;;  %v3021_v37 = vld [vmem:[#allocation8 + $0x18] sm:$0xff]  }
 0x132   :  { %2549 = vmatprep.subr.bf16.mxu0 %v2998_v38  ;;  %2571 = vmatprep.subr.bf16.mxu1 %v2999_v39  ;;  %v3022_v38 = vld [vmem:[#allocation8 + $0x20] sm:$0xff]   ;;  %v3023_v39 = vld [vmem:[#allocation8 + $0x28] sm:$0xff]  }
 0x135   :  { %2550 = vmatpush3.bf16.msra.mxu0 %v3000_v40  ;;  %2572 = vmatpush3.bf16.msra.mxu1 %v3001_v41  ;;  %v3024_v40 = vld [vmem:[#allocation8 + $0x30] sm:$0xff]   ;;  %v3025_v41 = vld [vmem:[#allocation8 + $0x38] sm:$0xff]  }
 0x136   :  { %2551 = vmatprep.subr.bf16.mxu0 %v3002_v42  ;;  %2573 = vmatprep.subr.bf16.mxu1 %v3003_v43  ;;  %v3026_v42 = vld [vmem:[#allocation10] sm:$0xff]   ;;  %v3027_v43 = vld [vmem:[#allocation10 + $0x8] sm:$0xff]  }
 0x139   :  { %2552 = vmatpush3.bf16.msra.mxu0 %v3004_v44  ;;  %2574 = vmatpush3.bf16.msra.mxu1 %v3005_v45  ;;  %v3028_v44 = vld [vmem:[#allocation10 + $0x10] sm:$0xff]   ;;  %v3029_v45 = vld [vmem:[#allocation10 + $0x18] sm:$0xff]  }
 0x13a   :  { %2553 = vmatprep.subr.bf16.mxu0 %v3006_v46  ;;  %2575 = vmatprep.subr.bf16.mxu1 %v3007_v47  ;;  %v3030_v46 = vld [vmem:[#allocation10 + $0x20] sm:$0xff]   ;;  %v3031_v47 = vld [vmem:[#allocation10 + $0x28] sm:$0xff]  }
 0x13d   :  { %2554 = vmatpush3.bf16.msra.mxu0 %v3008_v48  ;;  %2576 = vmatpush3.bf16.msra.mxu1 %v3009_v49 }
 0x13e   :  { %2555 = vmatprep.subr.bf16.mxu0 %v3010_v50  ;;  %2577 = vmatprep.subr.bf16.mxu1 %v3011_v51  ;;  %v2483_v50 = vld [vmem:[%s3357_s4] ss:$0 sm:$0xff] }
 0x141   :  { %2556 = vmatpush3.bf16.msra.mxu0 %v3012_v52  ;;  %2578 = vmatpush3.bf16.msra.mxu1 %v3013_v53 }
 0x142   :  { %2557 = vmatprep.subr.bf16.mxu0 %v3014_v54  ;;  %2579 = vmatprep.subr.bf16.mxu1 %v3015_v55 }
 0x145   :  { %2558 = vmatpush3.bf16.msra.mxu0 %v3016_v56  ;;  %2580 = vmatpush3.bf16.msra.mxu1 %v3017_v57 }
 0x146   :  { %2605 = vmatprep.subr.bf16.mxu0 %v3186_v58  ;;  %2625 = vmatprep.subr.bf16.mxu1 %v3186_v58 }
 0x1fb   :  { %v1488_v6 = vpop.f32.mrb[0].mxu0  ;;  %v1660_v7 = vpop.f32.mrb[0].mxu1 }
 0x1fc   :  { %v2645_v8 = vadd.f32 %v1488_v6, %v324_v2  ;;  %v2649_v9 = vadd.f32 %v1660_v7, %v332_v3  ;;  %v1490_v10 = vpop.f32.mrb[1].mxu0  ;;  %v1662_v11 = vpop.f32.mrb[1].mxu1  ;;  %v3033_v6 = vld [vmem:[#allocation10 + $0x38] sm:$0xff]   ;;  %v2516_v7 = vld [vmem:[%s3359_s6] ss:$0 sm:$0xff]  ;;  %s3144_s6 = scalar_lea.vmem %s2272_s16, 128 }
 0x1fd   :  { %v2646_v12 = vadd.f32 %v1490_v10, %v328_v4  ;;  %v2650_v13 = vadd.f32 %v1662_v11, %v336_v5  ;;  %v1492_v14 = vpop.f32.mrb[2].mxu0  ;;  %v1664_v15 = vpop.f32.mrb[2].mxu1  ;;  %p3145_p12 = scmp.ne.s32.totalorder %s2272_s16, %s3144_s6  ;;  %p3150_p0 = scmp.lt.s32.totalorder %s3144_s6, %s3144_s6 }
 0x1fe   :  { %v2647_v16 = vadd.f32 %v1492_v14, %v324_v2  ;;  %v2651_v17 = vadd.f32 %v1664_v15, %v332_v3  ;;  %v1494_v18 = vpop.f32.mrb[3].mxu0  ;;  %v1666_v19 = vpop.f32.mrb[3].mxu1  ;;  %v1669_v22 = vmax.f32 %v2645_v8, 0.0  ;;  %v1671_v23 = vmax.f32 %v2649_v9, 0.0 }
 0x1ff   :  { %v2648_v20 = vadd.f32 %v1494_v18, %v328_v4  ;;  %v2652_v21 = vadd.f32 %v1666_v19, %v336_v5  ;;  %v1670_v26 = vmax.f32 %v2646_v12, 0.0  ;;  %v1672_v27 = vmax.f32 %v2650_v13, 0.0  ;;  %v3032_v5 = vld [vmem:[#allocation10 + $0x30] sm:$0xff]   ;;  %p3151_p1 = por %p3150_p0, %p3149_p13 }
 0x200   :  { %v1673_v24 = vmax.f32 %v2647_v16, 0.0  ;;  %v1675_v25 = vmax.f32 %v2651_v17, 0.0 }
 0x201   :  { %v1674_v28 = vmax.f32 %v2648_v20, 0.0  ;;  %v1676_v29 = vmax.f32 %v2652_v21, 0.0  ;;  %p3152_p2 = pnand %p3151_p1, %p3145_p12 }
 0x202   :  { %v1677_v30 = vpack.c.bf16 %v1673_v24, %v1669_v22  ;;  %v1679_v31 = vpack.c.bf16 %v1675_v25, %v1671_v23 }
 0x203   :  { %v1678_v32 = vpack.c.bf16 %v1674_v28, %v1670_v26  ;;  %v1680_v33 = vpack.c.bf16 %v1676_v29, %v1672_v27 }
 0x205   :  { %1976 = vmatprep.mubr.bf16.mxu0 %v1678_v32  ;;  %2017 = vmatprep.mubr.bf16.mxu1 %v1680_v33 }
 0x206   :  { %1977 = vmatmul.mubr.bf16.vlgmr.msra.gmra.mrb[4].mxu0 %v1677_v30  ;;  %2018 = vmatmul.mubr.bf16.vlgmr.msra.gmra.mrb[4].mxu1 %v1679_v31 }
 0x207   :  { %2606 = vmatpush3.bf16.msra.mxu0 %v3018_v34  ;;  %2621 = vmatprep.mubr.msk.bf16.mxu0 %vm3187_vm1, %v3186_v58 }
 0x208   :  { %2607 = vmatprep.subr.bf16.mxu0 %v3186_v58  ;;  %2641 = vmatprep.mubr.msk.bf16.mxu1 %vm3187_vm1, %v3186_v58 }
 0x209   :  { %2626 = vmatpush3.bf16.msra.mxu1 %v3026_v42 }
 0x20a   :  { %2627 = vmatprep.subr.bf16.mxu1 %v3186_v58 }
 0x20b   :  { %2608 = vmatpush3.bf16.msra.mxu0 %v3019_v35 }
 0x20c   :  { %2609 = vmatprep.subr.bf16.mxu0 %v3186_v58 }
 0x20d   :  { %2628 = vmatpush3.bf16.msra.mxu1 %v3027_v43 }
 0x20e   :  { %2629 = vmatprep.subr.bf16.mxu1 %v3186_v58 }
 0x20f   :  { %2610 = vmatpush3.bf16.msra.mxu0 %v3020_v36 }
 0x210   :  { %2611 = vmatprep.subr.bf16.mxu0 %v3186_v58 }
 0x211   :  { %2630 = vmatpush3.bf16.msra.mxu1 %v3028_v44 }
 0x212   :  { %2631 = vmatprep.subr.bf16.mxu1 %v3186_v58 }
 0x213   :  { %2612 = vmatpush3.bf16.msra.mxu0 %v3021_v37 }
 0x214   :  { %2613 = vmatprep.subr.bf16.mxu0 %v3186_v58 }
 0x215   :  { %2632 = vmatpush3.bf16.msra.mxu1 %v3029_v45 }
 0x216   :  { %2633 = vmatprep.subr.bf16.mxu1 %v3186_v58 }
 0x217   :  { %2614 = vmatpush3.bf16.msra.mxu0 %v3022_v38 }
 0x218   :  { %2615 = vmatprep.subr.bf16.mxu0 %v3186_v58 }
 0x219   :  { %2634 = vmatpush3.bf16.msra.mxu1 %v3030_v46 }
 0x21a   :  { %2635 = vmatprep.subr.bf16.mxu1 %v3186_v58 }
 0x21b   :  { %2616 = vmatpush3.bf16.msra.mxu0 %v3023_v39 }
 0x21c   :  { %2617 = vmatprep.subr.bf16.mxu0 %v3186_v58 }
 0x21d   :  { %2636 = vmatpush3.bf16.msra.mxu1 %v3031_v47 }
 0x21e   :  { %2637 = vmatprep.subr.bf16.mxu1 %v3186_v58 }
 0x21f   :  { %2618 = vmatpush3.bf16.msra.mxu0 %v3024_v40 }
 0x220   :  { %2619 = vmatprep.subr.bf16.mxu0 %v3186_v58 }
 0x221   :  { %2638 = vmatpush3.bf16.msra.mxu1 %v3032_v5 }
 0x222   :  { %2639 = vmatprep.subr.bf16.mxu1 %v3186_v58  ;;  %v2525_v58 = vld [vmem:[%s3361_s8] ss:$0 sm:$0xff] }
 0x223   :  { %2620 = vmatpush3.bf16.msra.mxu0 %v3025_v41 }
 0x225   :  { %2640 = vmatpush3.bf16.msra.mxu1 %v3033_v6 }
 0x2d9   :  { %v2559_v48 = vpop.f32.mrb[4].mxu0  ;;  %v2581_v49 = vpop.f32.mrb[4].mxu1 }
 0x2da   :  { %v2560_v51 = vpop.f32.mrb[5].mxu0  ;;  %v2582_v52 = vpop.f32.mrb[5].mxu1 }
 0x2db   :  { %v2561_v53 = vadd.f32 %v2560_v51, %v2559_v48  ;;  %v2583_v54 = vadd.f32 %v2582_v52, %v2581_v49  ;;  %v2562_v55 = vpop.f32.mrb[6].mxu0  ;;  %v2584_v56 = vpop.f32.mrb[6].mxu1 }
 0x2dc   :  { %v2563_v57 = vpop.f32.mrb[7].mxu0  ;;  %v2585_v59 = vpop.f32.mrb[7].mxu1 }
 0x2dd   :  { %v1979_v60 = vadd.f32 %v2561_v53, %v2483_v50  ;;  %v2564_v61 = vadd.f32 %v2563_v57, %v2562_v55  ;;  %v2586_v62 = vadd.f32 %v2585_v59, %v2584_v56 }
 0x2df   :  { %v2020_v63 = vadd.f32 %v2583_v54, %v1979_v60  ;;  %v1982_v0 = vadd.f32 %v2564_v61, %v2483_v50 }
 0x2e1   :  { %v2023_v1 = vadd.f32 %v2586_v62, %v1982_v0  ;;  %v2026_v2 = vmax.f32 %v2020_v63, 0.0 }
 0x2e3   :  { %v2027_v3 = vmax.f32 %v2023_v1, 0.0 }
 0x2e5   :  { %v2028_v4 = vpack.c.bf16 %v2027_v3, %v2026_v2 }
 0x2e7   :  { %2622 = vmatmul.mubr.bf16.vlgmr.msra.gmra.mrb[8].mxu0 %v2028_v4 }
 0x3ba   :  { %v2134_v8 = vpop.f32.mrb[8].mxu0 }
 0x3bb   :  { %v2135_v9 = vadd.f32 %v2516_v7, %v2134_v8  ;;  %v2623_v10 = vpop.f32.mrb[9].mxu0 }
 0x3bc   :  { %v2137_v11 = vpop.f32.mrb[10].mxu0 }
 0x3bd   :  { %v2138_v12 = vadd.f32 %v2516_v7, %v2137_v11  ;;  %v2624_v13 = vpop.f32.mrb[11].mxu0  ;;  %v2141_v14 = vmax.f32 %v2135_v9, 0.0 }
 0x3bf   :  { %v2142_v15 = vmax.f32 %v2138_v12, 0.0 }
 0x3c1   :  { %v2143_v16 = vpack.c.bf16 %v2142_v15, %v2141_v14 }
 0x3c3   :  { %2642 = vmatmul.mubr.bf16.vlgmr.msra.gmra.mrb[8].mxu1 %v2143_v16 }
 0x496   :  { %v2249_v17 = vpop.f32.mrb[8].mxu1 }
 0x497   :  { %v2643_v18 = vpop.f32.mrb[9].mxu1  ;;  %v2250_v20 = vadd.f32 %v2525_v58, %v2249_v17 }
 0x498   :  { %v2252_v19 = vpop.f32.mrb[10].mxu1 }
 0x499   :  { %v2253_v21 = vadd.f32 %v2525_v58, %v2252_v19  ;;  %v2644_v22 = vpop.f32.mrb[11].mxu1 }
 0x49b   :  { %v2541_v23 = vpack.c.bf16 %v2253_v21, %v2250_v20 }
 0x49d   :  { %2542 = vst [vmem:[#allocation11] sm:$0xff] %v2541_v23  }
 0x49e   :  { %3155 = shalt.err (!%p3152_p2)
}
 0x49f   :  { %s3156_s18 = scalar_lea.hbm %s3362_s9, 128 }
 0x4a0   :  { %p3157_p3 = scmp.ne.s32.totalorder %s3362_s9, %s3156_s18  ;;  %p3160_p4 = scmp.lt.u32.totalorder %s3156_s18, %s3362_s9 }
 0x4a2   :  { %p3162_p5 = pnand %p3160_p4, %p3157_p3 }
 0x4a4   :  { %3165 = shalt.err (!%p3162_p5)
}
 0x4a5   :  { %2277 = dma.vmem_to_hbm [thread:$0]  %s2272_s16, 128, %s3362_s9, [#allocation4], %s3179_s10, %s3179_s10, %s3180_s14  }
 0x4a6   :  { %3172 = dma.done.wait [#allocation4], 128  }
 0x4a7   :  { %3173 = vsyncadd [#allocation4], 4294967168 }
 0x4a8   :  { %2281 = vsyncpa [#allocation3], 1 }
 0x4a9   :  { %2282 = vsyncpa [#allocation6], 1 }
 0x4aa   :  { %2283 = vsyncpa [#allocation9], 1 }
 0x4ab   :  { %2284 = vsyncpa [#allocation4], 1 }

</bundles_post_ra>
